<compile_context>
chip_gen: v6e
topology: v6e:2x2x1
jax: 0.10.0
libtpu: 0.0.40
codegen_flags: <defaults>
</compile_context>

<pallas_src>
import functools

import jax
import jax.numpy as jnp
from jax import lax
from jax.experimental import pallas as pl
from jax.experimental.pallas import tpu as pltpu


def _round_up(a, b):
    return ((a + b - 1) // b) * b


def _mlp_softmax_kernel(x_ref, w1_ref, b1_ref, w2_ref, b2_ref, out_ref):
    # fc1: x [TB, D_in] (bf16) x w1 [H, D_in] (bf16, PyTorch layout) -> [TB, H] f32
    h = lax.dot_general(
        x_ref[...], w1_ref[...],
        dimension_numbers=(((1,), (1,)), ((), ())),
        preferred_element_type=jnp.float32,
    )
    h = jnp.maximum(h + b1_ref[...], 0.0)

    # fc2: h [TB, H] x w2 [C_pad, H] (bf16, PyTorch layout, lane-padded) -> [TB, C_pad] f32
    logits = lax.dot_general(
        h.astype(jnp.bfloat16), w2_ref[...],
        dimension_numbers=(((1,), (1,)), ((), ())),
        preferred_element_type=jnp.float32,
    ) + b2_ref[...]                       # pad lanes carry -1e30 bias -> exp == 0

    # softmax over classes (PyTorch dim=1); pad lanes drop out of the sum.
    m = jnp.max(logits, axis=-1, keepdims=True)
    e = jnp.exp(logits - m)
    denom = jnp.sum(e, axis=-1, keepdims=True)
    out_ref[...] = (e * pl.reciprocal(denom)).astype(out_ref.dtype)


def prepare_params(w1, b1, w2, b2, lane_pad=128):
    """One-time (outside the hot path) param prep: cast to bf16, pad fc2 lanes."""
    num_classes, hidden_dim = w2.shape
    c_pad = _round_up(max(num_classes, lane_pad), lane_pad)

    w1_p = jnp.asarray(w1, jnp.bfloat16)                       # [H, D_in]
    b1_p = jnp.asarray(b1, jnp.float32)[None, :]               # [1, H]
    w2_p = (jnp.zeros((c_pad, hidden_dim), jnp.bfloat16)
            .at[:num_classes].set(jnp.asarray(w2, jnp.bfloat16)))   # [C_pad, H]
    b2_p = (jnp.full((1, c_pad), -1e30, jnp.float32)
            .at[0, :num_classes].set(jnp.asarray(b2, jnp.float32)))  # [1, C_pad]
    return (w1_p, b1_p, w2_p, b2_p, num_classes)


def detection_probability_forward(x, params, batch_tile=None):
    """x: [B, input_dim]; params from prepare_params; returns probs [B, num_classes]."""
    w1_p, b1_p, w2_p, b2_p, num_classes = params
    B, d_in = x.shape
    hidden_dim = w1_p.shape[0]
    c_pad = w2_p.shape[0]

    # Batch tile: multiple of 8, capped so large batches pipeline over a grid.
    if batch_tile is None:
        batch_tile = min(512, _round_up(B, 8))
    tb = max(8, _round_up(batch_tile, 8))
    b_pad = _round_up(B, tb)

    x_bf = jnp.asarray(x, jnp.bfloat16)
    if b_pad != B:
        x_bf = jnp.pad(x_bf, ((0, b_pad - B), (0, 0)))

    grid = (b_pad // tb,)

    flops = 2 * b_pad * (d_in * hidden_dim + hidden_dim * c_pad)
    transcendentals = b_pad * c_pad
    bytes_accessed = (x_bf.size * 2 + w1_p.size * 2 + w2_p.size * 2
                      + b1_p.size * 4 + b2_p.size * 4 + b_pad * c_pad * 4)

    out = pl.pallas_call(
        _mlp_softmax_kernel,
        out_shape=jax.ShapeDtypeStruct((b_pad, c_pad), jnp.float32),
        grid=grid,
        in_specs=[
            pl.BlockSpec((tb, d_in), lambda i: (i, 0)),          # x: batch-tiled
            pl.BlockSpec((hidden_dim, d_in), lambda i: (0, 0)),  # w1: resident
            pl.BlockSpec((1, hidden_dim), lambda i: (0, 0)),     # b1: resident
            pl.BlockSpec((c_pad, hidden_dim), lambda i: (0, 0)),  # w2: resident
            pl.BlockSpec((1, c_pad), lambda i: (0, 0)),          # b2: resident
        ],
        out_specs=pl.BlockSpec((tb, c_pad), lambda i: (i, 0)),   # lane-dense output
        compiler_params=pltpu.CompilerParams(
            dimension_semantics=("parallel",)),
        cost_estimate=pl.CostEstimate(
            flops=int(flops),
            transcendentals=int(transcendentals),
            bytes_accessed=int(bytes_accessed)),
    )(x_bf, w1_p, b1_p, w2_p, b2_p)

    return out[:B, :num_classes]


def _reference_f32(x, w1, b1, w2, b2):
    h = jnp.maximum(x @ w1.T + b1, 0.0)
    logits = h @ w2.T + b2
    return jax.nn.softmax(logits, axis=1)


def _reference_bf16(x, w1, b1, w2, b2):
    # Same bf16-input / f32-accumulate matmul recipe as the kernel.
    dn = (((1,), (1,)), ((), ()))
    h = lax.dot_general(x.astype(jnp.bfloat16), w1.astype(jnp.bfloat16), dn,
                        preferred_element_type=jnp.float32) + b1
    h = jnp.maximum(h, 0.0)
    logits = lax.dot_general(h.astype(jnp.bfloat16), w2.astype(jnp.bfloat16), dn,
                             preferred_element_type=jnp.float32) + b2
    return jax.nn.softmax(logits, axis=1)


if __name__ == "__main__":
    batch, input_dim, hidden_dim, num_classes = 20, 32, 32, 2

    key = jax.random.PRNGKey(0)
    kx, kw1, kb1, kw2, kb2 = jax.random.split(key, 5)

    x = jax.random.normal(kx, (batch, input_dim), dtype=jnp.float32)
    # PyTorch nn.Linear layouts: weight [out, in], bias [out].
    w1 = jax.random.normal(kw1, (hidden_dim, input_dim), dtype=jnp.float32) * 0.1
    b1 = jax.random.normal(kb1, (hidden_dim,), dtype=jnp.float32) * 0.1
    w2 = jax.random.normal(kw2, (num_classes, hidden_dim), dtype=jnp.float32) * 0.1
    b2 = jax.random.normal(kb2, (num_classes,), dtype=jnp.float32) * 0.1

    params = prepare_params(w1, b1, w2, b2)          # one-time prep (bf16 cast + pad)
    # batch_tile=8 -> grid of 3 tiles (batch 20 padded to 24): exercises tiling + padding.
    probs = detection_probability_forward(x, params, batch_tile=8)
    probs = jax.block_until_ready(probs)

    ref_bf16 = _reference_bf16(x, w1, b1, w2, b2)
    ref_f32 = _reference_f32(x, w1, b1, w2, b2)

    assert probs.shape == (batch, num_classes)
    # Tight check vs a reference using the same bf16-matmul / f32-accumulate recipe.
    assert jnp.allclose(probs, ref_bf16, atol=2e-3, rtol=2e-3)
    # Looser check vs the pure-f32 PyTorch-equivalent reference (bf16 input rounding).
    assert jnp.allclose(probs, ref_f32, atol=3e-2, rtol=3e-2)
    # Softmax rows sum to 1 (exact reciprocal, pad lanes excluded).
    assert jnp.allclose(jnp.sum(probs, axis=1), 1.0, atol=1e-5)

    print("KERNEL_OK")
</pallas_src>

<mosaic_0001>
module attributes {stable_mosaic.version = 11 : i64} {
  func.func @_mlp_softmax_kernel(%arg0: i32, %arg1: memref<8x32xbf16, #tpu.memory_space<vmem>>, %arg2: memref<32x32xbf16, #tpu.memory_space<vmem>>, %arg3: memref<1x32xf32, #tpu.memory_space<vmem>>, %arg4: memref<128x32xbf16, #tpu.memory_space<vmem>>, %arg5: memref<1x128xf32, #tpu.memory_space<vmem>>, %arg6: memref<8x128xf32, #tpu.memory_space<vmem>>) attributes {dimension_semantics = [#tpu.dimension_semantics<parallel>], iteration_bounds = array<i64: 3>, scalar_prefetch = 0 : i64, scratch_operands = 0 : i64, tpu.core_type = #tpu.core_type<tc>, window_params = [{transform_indices = @transform_0, window_bounds = array<i64: 8, 32>}, {pipeline_mode = #tpu.pipeline_mode<synchronous>, transform_indices = @transform_1, window_bounds = array<i64: 32, 32>}, {pipeline_mode = #tpu.pipeline_mode<synchronous>, transform_indices = @transform_2, window_bounds = array<i64: 1, 32>}, {pipeline_mode = #tpu.pipeline_mode<synchronous>, transform_indices = @transform_3, window_bounds = array<i64: 128, 32>}, {pipeline_mode = #tpu.pipeline_mode<synchronous>, transform_indices = @transform_4, window_bounds = array<i64: 1, 128>}, {transform_indices = @transform_5, window_bounds = array<i64: 8, 128>}]} {
    %c0 = arith.constant 0 : index
    %c0_0 = arith.constant 0 : index
    %0 = vector.load %arg1[%c0, %c0_0] : memref<8x32xbf16, #tpu.memory_space<vmem>>, vector<8x32xbf16>
    %c0_1 = arith.constant 0 : index
    %c0_2 = arith.constant 0 : index
    %1 = vector.load %arg2[%c0_1, %c0_2] : memref<32x32xbf16, #tpu.memory_space<vmem>>, vector<32x32xbf16>
    %cst = arith.constant dense<0.000000e+00> : vector<8x32xf32>
    %2 = tpu.matmul %0, %1, %cst {dimension_numbers = #tpu.dot_dimension_numbers<[1], [1], [0], [0], [0, 0, 1, 0], [], []>} : vector<8x32xbf16>, vector<32x32xbf16>, vector<8x32xf32> -> vector<8x32xf32>
    %c0_3 = arith.constant 0 : index
    %c0_4 = arith.constant 0 : index
    %3 = vector.load %arg3[%c0_3, %c0_4] : memref<1x32xf32, #tpu.memory_space<vmem>>, vector<1x32xf32>
    %4 = vector.broadcast %3 : vector<1x32xf32> to vector<8x32xf32>
    %5 = arith.addf %2, %4 : vector<8x32xf32>
    %cst_5 = arith.constant 0.000000e+00 : f32
    %6 = vector.broadcast %cst_5 : f32 to vector<8x32xf32>
    %7 = arith.maximumf %5, %6 : vector<8x32xf32>
    %8 = arith.truncf %7 : vector<8x32xf32> to vector<8x32xbf16>
    %c0_6 = arith.constant 0 : index
    %c0_7 = arith.constant 0 : index
    %9 = vector.load %arg4[%c0_6, %c0_7] : memref<128x32xbf16, #tpu.memory_space<vmem>>, vector<128x32xbf16>
    %cst_8 = arith.constant dense<0.000000e+00> : vector<8x128xf32>
    %10 = tpu.matmul %8, %9, %cst_8 {dimension_numbers = #tpu.dot_dimension_numbers<[1], [1], [0], [0], [0, 0, 1, 0], [], []>} : vector<8x32xbf16>, vector<128x32xbf16>, vector<8x128xf32> -> vector<8x128xf32>
    %c0_9 = arith.constant 0 : index
    %c0_10 = arith.constant 0 : index
    %11 = vector.load %arg5[%c0_9, %c0_10] : memref<1x128xf32, #tpu.memory_space<vmem>>, vector<1x128xf32>
    %12 = vector.broadcast %11 : vector<1x128xf32> to vector<8x128xf32>
    %13 = arith.addf %10, %12 : vector<8x128xf32>
    %cst_11 = arith.constant dense<0xFF800000> : vector<8xf32>
    %14 = vector.multi_reduction <maximumf>, %13, %cst_11 [1] : vector<8x128xf32> to vector<8xf32>
    %15 = vector.shape_cast %14 : vector<8xf32> to vector<8x1xf32>
    %16 = vector.broadcast %15 : vector<8x1xf32> to vector<8x128xf32>
    %17 = arith.subf %13, %16 : vector<8x128xf32>
    %18 = math.exp %17 : vector<8x128xf32>
    %cst_12 = arith.constant dense<0.000000e+00> : vector<8xf32>
    %19 = vector.multi_reduction <add>, %18, %cst_12 [1] : vector<8x128xf32> to vector<8xf32>
    %20 = vector.shape_cast %19 : vector<8xf32> to vector<8x1xf32>
    %21 = tpu.reciprocal %20 : vector<8x1xf32> -> vector<8x1xf32>
    %22 = vector.broadcast %21 : vector<8x1xf32> to vector<8x128xf32>
    %23 = arith.mulf %18, %22 : vector<8x128xf32>
    %c0_13 = arith.constant 0 : index
    %c0_14 = arith.constant 0 : index
    %24 = vector.load %arg6[%c0_13, %c0_14] : memref<8x128xf32, #tpu.memory_space<vmem>>, vector<8x128xf32>
    tpu.vector_store %arg6[%c0_13, %c0_14], %23 {strides = array<i32>} : memref<8x128xf32, #tpu.memory_space<vmem>>, vector<8x128xf32>,
    return
  }
  func.func @transform_0(%arg0: i32) -> (i32, i32) {
    %c0_i32 = arith.constant 0 : i32
    %c0_i32_0 = arith.constant 0 : i32
    return %arg0, %c0_i32 : i32, i32
  }
  func.func @transform_1(%arg0: i32) -> (i32, i32) {
    %c0_i32 = arith.constant 0 : i32
    %c0_i32_0 = arith.constant 0 : i32
    %c0_i32_1 = arith.constant 0 : i32
    return %c0_i32, %c0_i32_0 : i32, i32
  }
  func.func @transform_2(%arg0: i32) -> (i32, i32) {
    %c0_i32 = arith.constant 0 : i32
    %c0_i32_0 = arith.constant 0 : i32
    %c0_i32_1 = arith.constant 0 : i32
    return %c0_i32, %c0_i32_0 : i32, i32
  }
  func.func @transform_3(%arg0: i32) -> (i32, i32) {
    %c0_i32 = arith.constant 0 : i32
    %c0_i32_0 = arith.constant 0 : i32
    %c0_i32_1 = arith.constant 0 : i32
    return %c0_i32, %c0_i32_0 : i32, i32
  }
  func.func @transform_4(%arg0: i32) -> (i32, i32) {
    %c0_i32 = arith.constant 0 : i32
    %c0_i32_0 = arith.constant 0 : i32
    %c0_i32_1 = arith.constant 0 : i32
    return %c0_i32, %c0_i32_0 : i32, i32
  }
  func.func @transform_5(%arg0: i32) -> (i32, i32) {
    %c0_i32 = arith.constant 0 : i32
    %c0_i32_0 = arith.constant 0 : i32
    return %arg0, %c0_i32 : i32, i32
  }
}

</mosaic_0001>

<bundles_post_ra>
// kernel: tpu_custom_call.1
= control target key start
LH: loop header
LB: loop body
LE: loop exit
PB: predicated region body
PF: predicated region fallthrough
CT: control target
= control target key end

     0   :  { %10 = vsyncpa [#allocation3], 0  ;;  %s857_s0 = inlined_call_operand.vmem [shape: bf16[24,32], index: 0, kind: input, shape index: {}]   ;;  %s858_s1 = inlined_call_operand.vmem [shape: bf16[32,32], index: 1, kind: input, shape index: {}]   ;;  %s859_s2 = inlined_call_operand.vmem [shape: f32[1,32], index: 2, kind: input, shape index: {}]   ;;  %s860_s3 = inlined_call_operand.vmem [shape: bf16[128,32], index: 3, kind: input, shape index: {}]   ;;  %s861_s4 = inlined_call_operand.vmem [shape: f32[1,128], index: 4, kind: input, shape index: {}]   ;;  %s862_s5 = inlined_call_operand.hbm [shape: f32[24,128], index: 5, kind: output, shape index: {}]  }
   0x1   :  { %12 = vsyncpa [#allocation3 + $0x1], 0  ;;  %s722_s18 = smov 0   ;;  %s724_s19 = smov 0  }
   0x2   :  { %s726_s20 = smov 0   ;;  %s728_s21 = smov 0  }
   0x3 LB: > { %s743_s22 = sadd.s32 4294967295, %s687_s21   ;;  %s508_s23 = sadd.s32 4294967294, %s687_s21   ;;  %s687_s21 = sphi %s728_s21, %s868_s21   ;;  %s683_s20 = sphi %s726_s20, %s867_s20   ;;  %s679_s19 = sphi %s724_s19, %s866_s19   ;;  %s675_s18 = sphi %s722_s18, %s865_s18  }
   0x4   : > { %s747_s24 = sadd.s32 1, %s687_s21   ;;  %s135_s25 = sadd.s32 1, %s683_s20 }
   0x5   : > { %s132_s26 = ssub.s32 %s687_s21, %s747_s24  ;;  %p145_p0 = scmp.ne.s32.totalorder %s683_s20, %s679_s19 }
   0x6   : > { %p133_p1 = scmp.eq.s32.totalorder %s132_s26, 0  ;;  %p146_p2 = scmp.eq.s32.totalorder %s743_s22, 2 }
   0x7   : > { %p151_p3 = scmp.ne.s32.totalorder %s679_s19, %s675_s18  ;;  %p152_p4 = scmp.eq.s32.totalorder %s508_s23, 2 }
   0x8   : > { %s758_s27 = scalar_select %p133_p1, %s683_s20, %s135_s25  }
   0x9   : > { %p760_p5 = por %p146_p2, %p145_p0  ;;  %p764_p6 = por %p152_p4, %p151_p3 }
   0xa   : > { %p511_p7 = scmp.ge.s32.totalorder %s687_s21, 1  ;;  %p189_p8 = scmp.lt.s32.totalorder %s687_s21, 4 }
   0xc   : > { %p190_p9 = pnand %p511_p7, %p189_p8 }
   0xd   : > { %p216_p10 = scmp.lt.s32.totalorder (!%p190_p9), %s743_s22, 2  ;;  %s213_s23 = sand.u32 (!%p190_p9), 1, %s679_s19  }
   0xe   : > { %193 = sbr.rel (%p190_p9) target bundleno = 753 (0x2f1), region = 40  ;;  %s512_s25 = sshll.u32 (!%p190_p9), %s213_s23, 3 }
   0xf   : > { %s529_s26 = sshll.u32 (!%p190_p9), %s743_s22, 7  ;;  %s215_s30 = scalar_lea.vmem (!%p190_p9), [#allocation2], %s512_s25 }
  0x10   : > { %s449_s6 = sshll.u32 (!%p190_p9), %s215_s30, 4  ;;  %s447_s9 = scalar_lea.hbm (!%p190_p9), %s862_s5, %s529_s26  ;;  %s450_s6 = int_to_ptr.vmem [resolvable:$true] %s449_s6 }
  0x11   : > { %s436_s10 = scalar_lea.sflag (!%p190_p9), [#allocation3], %s213_s23  ;;  %s691_s12 = smov (!%p190_p9), [#allocation2]  }
  0x12   : > { %s631_s13 = sshll.u32 (!%p190_p9), %s691_s12, 4  ;;  %s632_s13 = int_to_ptr.vmem [resolvable:$false] %s631_s13 }
  0x13   : > { %v613_v0 = vld [vmem:[%s858_s1 + $0x8] sm:$0xff]   ;;  %v689_v1 = vmov 0.0   ;;  %vm243_vm0 = vcmask 261120   ;;  %v615_v3 = vld [vmem:[%s860_s3 + $0x38] sm:$0xff]   ;;  %vm690_vm1 = vmmov 0   ;;  %v614_v4 = vld [vmem:[%s858_s1] sm:$0xff]   ;;  %p634_p0 = scmp.lt.s32.totalorder %s450_s6, %s632_s13 }
  0x14   : > { %544 = vmatprep.subr.bf16.mxu0 %v689_v1  ;;  %552 = vmatprep.subr.bf16.mxu1 %v689_v1  ;;  %v251_v2 = vsel %vm243_vm0, %v613_v0, 0  ;;  %v383_v5 = vsel %vm243_vm0, %v615_v3, 0  ;;  %s217_s11 = scalar_select %p216_p10, %s743_s22, 2  ;;  %v616_v6 = vld [vmem:[%s860_s3 + $0x30] sm:$0xff]   ;;  %v248_v7 = vsel %vm243_vm0, %v614_v4, 0  ;;  %v617_v9 = vld [vmem:[%s860_s3 + $0x28] sm:$0xff]  }
  0x15   : > { %545 = vmatpush3.bf16.xpose.msra.mxu0 %v251_v2  ;;  %548 = vmatprep.mubr.msk.bf16.mxu0 %vm690_vm1, %v689_v1  ;;  %v380_v8 = vsel %vm243_vm0, %v616_v6, 0  ;;  %v377_v11 = vsel %vm243_vm0, %v617_v9, 0  ;;  %v618_v12 = vld [vmem:[%s860_s3 + $0x20] sm:$0xff]   ;;  %v619_v14 = vld [vmem:[%s860_s3 + $0x18] sm:$0xff]   ;;  %v620_v16 = vld [vmem:[%s860_s3 + $0x10] sm:$0xff]   ;;  %s633_s22 = scalar_lea.vmem %s632_s13, 256 }
  0x16   : > { %546 = vmatprep.subr.bf16.mxu0 %v689_v1  ;;  %568 = vmatprep.mubr.msk.bf16.mxu1 %vm690_vm1, %v689_v1  ;;  %s513_s14 = sshll.u32 %s217_s11, 2  ;;  %v374_v13 = vsel %vm243_vm0, %v618_v12, 0  ;;  %v371_v15 = vsel %vm243_vm0, %v619_v14, 0  ;;  %v368_v17 = vsel %vm243_vm0, %v620_v16, 0  ;;  %v621_v18 = vld [vmem:[%s860_s3 + $0x8] sm:$0xff]   ;;  %v622_v20 = vld [vmem:[%s860_s3] sm:$0xff]  }
  0x17   : > { %553 = vmatpush3.bf16.xpose.msra.mxu1 %v383_v5  ;;  %s219_s17 = scalar_lea.vmem %s857_s0, %s513_s14  ;;  %v365_v19 = vsel %vm243_vm0, %v621_v18, 0  ;;  %v362_v21 = vsel %vm243_vm0, %v622_v20, 0  ;;  %v514_v22 = vld [vmem:[%s859_s2] ss:$0 sm:$0xff]  ;;  %s627_s11 = scalar_lea.vmem %s450_s6, 128 }
  0x18   : > { %554 = vmatprep.subr.bf16.mxu1 %v689_v1  ;;  %v221_v10 = vld [vmem:[%s219_s17] sm:$0xf]  ;;  %p628_p11 = scmp.ne.s32.totalorder %s450_s6, %s627_s11  ;;  %p635_p1 = scmp.lt.s32.totalorder %s633_s22, %s627_s11 }
  0x19   : > { %v518_v30 = vld [vmem:[%s861_s4] ss:$0 sm:$0xff] }
  0x1a   : > { %p629_p12 = pnand %p628_p11, %p760_p5  ;;  %p636_p2 = por %p635_p1, %p634_p0 }
  0x1c   : > { %p630_p13 = pneg %p629_p12 }
  0x1d   : > { %547 = vmatpush3.bf16.xpose.msra.mxu0 %v248_v7 }
  0x1e   : > { %p637_p3 = pnand %p636_p2, %p630_p13 }
  0x1f   : > { %555 = vmatpush3.bf16.xpose.msra.mxu1 %v380_v8 }
  0x20   : > { %556 = vmatprep.subr.bf16.mxu1 %v689_v1 }
  0x24   : > { %549 = vmatmul.mubr.msk.bf16.vlgmr.msra.gmra.mxu0 %vm243_vm0, %v221_v10 }
  0x27   : > { %557 = vmatpush3.bf16.xpose.msra.mxu1 %v377_v11 }
  0x28   : > { %558 = vmatprep.subr.bf16.mxu1 %v689_v1 }
  0x2f   : > { %559 = vmatpush3.bf16.xpose.msra.mxu1 %v374_v13 }
  0x30   : > { %560 = vmatprep.subr.bf16.mxu1 %v689_v1 }
  0x37   : > { %561 = vmatpush3.bf16.xpose.msra.mxu1 %v371_v15 }
  0x38   : > { %562 = vmatprep.subr.bf16.mxu1 %v689_v1 }
  0x3f   : > { %563 = vmatpush3.bf16.xpose.msra.mxu1 %v368_v17 }
  0x40   : > { %564 = vmatprep.subr.bf16.mxu1 %v689_v1 }
  0x47   : > { %565 = vmatpush3.bf16.xpose.msra.mxu1 %v365_v19 }
  0x48   : > { %566 = vmatprep.subr.bf16.mxu1 %v689_v1 }
  0x4f   : > { %567 = vmatpush3.bf16.xpose.msra.mxu1 %v362_v21 }
  0xe4   : > { %v287_v23 = vpop.f32.mrf.mxu0 }
  0xe5   : > { %v288_v24 = vadd.f32 %v514_v22, %v287_v23 }
  0xe6   : > { %v550_v25 = vpop.f32.mrf.mxu0 }
  0xe7   : > { %v293_v26 = vmax.f32 %v288_v24, 0.0 }
  0xe8   : > { %v290_v27 = vpop.f32.mrf.mxu0 }
  0xe9   : > { %v294_v28 = vpack.c.bf16 %v293_v26, %v293_v26 }
  0xea   : > { %v551_v29 = vpop.f32.mrf.mxu0 }
  0xeb   : > { %569 = vmatmul.mubr.msk.bf16.vlgmr.msra.gmra.mxu1 %vm243_vm0, %v294_v28 }
 0x1ab   : > { %v419_v31 = vpop.f32.mrf.mxu1 }
 0x1ac   : > { %v420_v32 = vadd.f32 %v518_v30, %v419_v31 }
 0x1ad   : > { %v570_v33 = vpop.f32.mrf.mxu1 }
 0x1ae   : > { %425 = vmax.xlane.f32.xlu0 %v420_v32 }
 0x1af   : > { %v422_v34 = vpop.f32.mrf.mxu1 }
 0x1b1   : > { %v571_v35 = vpop.f32.mrf.mxu1 }
 0x237   : > { %v426_v36 = vpop.xlane.xlu0 %425 }
 0x238   : > { %v427_v37 = vsub.f32 %v420_v32, %v426_v36 }
 0x23a   : > { %v428_v38 = vmul.f32 1.442695, %v427_v37 }
 0x23c   : > { %623 = vpow2.f32 %v428_v38 }
 0x249   : > { %v624_v39 = vpop.eup %623 }
 0x24a   : > { %430 = vadd.xlane.f32.xlu0 %v624_v39 }
 0x2d3   : > { %v431_v40 = vpop.xlane.xlu0 %430 }
 0x2d4   : > { %625 = vrcp.f32 %v431_v40 }
 0x2e1   : > { %v626_v41 = vpop.eup %625 }
 0x2e2   : > { %v433_v42 = vmul.f32 %v626_v41, %v624_v39 }
 0x2e4   : > { %434 = vst [vmem:[%s215_s30] sm:$0xff] %v433_v42 }
 0x2e5   : > { %640 = shalt.err (!%p637_p3)
}
 0x2e6   : > { %s641_s14 = scalar_lea.hbm %s447_s9, 128  ;;  %s645_s17 = scalar_lea.hbm %s862_s5, 384 }
 0x2e7   : > { %p642_p4 = scmp.ne.s32.totalorder %s447_s9, %s641_s14  ;;  %p646_p9 = scmp.lt.s32.totalorder %s447_s9, %s862_s5 }
 0x2e8   : > { %p647_p10 = scmp.lt.s32.totalorder %s645_s17, %s641_s14 }
 0x2e9   : > { %p643_p7 = pnand %p642_p4, %p760_p5 }
 0x2ea   : > { %p648_p11 = por %p647_p10, %p646_p9 }
 0x2eb   : > { %p644_p8 = pneg %p643_p7 }
 0x2ed   : > { %p649_p12 = pnand %p648_p11, %p644_p8 }
 0x2ef   : > { %652 = shalt.err (!%p649_p12)
}
 0x2f0   : > { %572 = dma.vmem_to_hbm [thread:$0]  (%p760_p5), %s450_s6, 128, %s447_s9, %s436_s10  }
 0x2f1 PF: > { %p578_p13 = scmp.ge.s32.totalorder %s687_s21, 2  ;;  %s461_s26 = sand.u32 1, %s675_s18  }
 0x2f2   : > { %s462_s30 = scalar_lea.sflag [#allocation3], %s461_s26 }
 0x2f3   : > { %p575_p0 = pnand %p578_p13, %p764_p6 }
 0x2f5   : > { %p576_p1 = pneg %p575_p0 }
 0x2f7   : > { %670 = dma.done.wait (%p576_p1), %s462_s30, 128  }
 0x2f8   : > { %672 = vsyncadd (%p576_p1), %s462_s30, 4294967168  ;;  %p15_p2 = scmp.ge.s32.totalorder %s747_s24, 5   ;;  %s865_s18 = smov %s679_s19 }
 0x2f9   : > { %s866_s19 = smov %s683_s20  ;;  %s867_s20 = smov %s758_s27 }
 0x2fa   : > { %s868_s21 = smov %s747_s24  ;;  %17 = sbr.rel (!%p15_p2) target bundleno = 3 (0x3), region = 75 }
 0x2ff   :  { %467 = vsyncpa [#allocation3], 1 }
 0x300   :  { %469 = vsyncpa [#allocation3 + $0x1], 1 }

</bundles_post_ra>
